<compile_context>
chip_gen: v6e
topology: v6e:2x2x1
jax: 0.10.0
libtpu: 0.0.40
codegen_flags: <defaults>
</compile_context>

<pallas_src>
import jax
import jax.numpy as jnp
from jax.experimental import pallas as pl
from jax.experimental.pallas import tpu as pltpu


def _round_up(x, m):
    return ((x + m - 1) // m) * m


def _cdiv(a, b):
    return (a + b - 1) // b


def _vmem_capacity_bytes():
    try:
        return int(pltpu.get_tpu_info().vmem_capacity_bytes)
    except Exception:
        return 64 << 20  # conservative fallback (v7x per-TC VMEM)


# -----------------------------------------------------------------------------
# Kernel: one (batch-tile i, hidden-tile j) grid step of out = (x@W1+b1)@W2+b2
# -----------------------------------------------------------------------------
def mlp_kernel(x_ref, w1_ref, b1_ref, w2_ref, b2_ref, out_ref, acc_ref):
    j = pl.program_id(1)

    @pl.when(j == 0)
    def _():
        acc_ref[...] = jnp.zeros_like(acc_ref)

    # h_j = x_i @ W1[:, j] + b1[j]   (MXU, f32 accumulation)
    h = jnp.dot(x_ref[...], w1_ref[...], preferred_element_type=jnp.float32)
    h = h + b1_ref[...]

    # Cast the f32 intermediate to the weight dtype for the second MXU pass.
    # This is a no-op for f32 params; for bf16 params it keeps the MXU on its
    # native bf16 path while the accumulator stays f32.
    acc_ref[...] += jnp.dot(h.astype(w2_ref.dtype), w2_ref[...],
                            preferred_element_type=jnp.float32)

    @pl.when(j == pl.num_programs(1) - 1)
    def _():
        out_ref[...] = (acc_ref[...] + b2_ref[...]).astype(out_ref.dtype)


# -----------------------------------------------------------------------------
# One-time parameter prep (hoisted out of the hot path)
# -----------------------------------------------------------------------------
def prepare_mlp_params(w1, b1, w2, b2):
    """Zero-pad parameters once to lane-dense (multiple-of-128) shapes.

    Weights are stored [in, out] (pre-transposed w.r.t. torch nn.Linear) so the
    kernel computes plain x @ W + b.  Returns (padded params, true dims).
    """
    in_dim, hid = w1.shape
    out_dim = w2.shape[1]
    in_p = _round_up(in_dim, 128)
    hid_p = _round_up(hid, 128)
    out_p = _round_up(out_dim, 128)
    w1_p = jnp.zeros((in_p, hid_p), w1.dtype).at[:in_dim, :hid].set(w1)
    b1_p = jnp.zeros((1, hid_p), b1.dtype).at[0, :hid].set(b1)
    w2_p = jnp.zeros((hid_p, out_p), w2.dtype).at[:hid, :out_dim].set(w2)
    b2_p = jnp.zeros((1, out_p), b2.dtype).at[0, :out_dim].set(b2)
    return (w1_p, b1_p, w2_p, b2_p), (in_dim, hid, out_dim)


# -----------------------------------------------------------------------------
# Forward
# -----------------------------------------------------------------------------
def mlp_forward(x, padded_params, dims, *, tile_n=1024, tile_h_cap=512):
    """x: [N, in_dim]; padded_params/dims from prepare_mlp_params()."""
    w1_p, b1_p, w2_p, b2_p = padded_params
    in_dim, hid, out_dim = dims
    in_p, hid_p = w1_p.shape
    out_p = w2_p.shape[1]
    n = x.shape[0]

    out_dt = x.dtype                 # result dtype follows the input
    wdt = w1_p.dtype                 # compute dtype follows the parameters
    bpe_w = w1_p.dtype.itemsize
    bpe_o = jnp.dtype(out_dt).itemsize

    # ---- batch tiling -------------------------------------------------------
    sublane = 8 if bpe_w >= 4 else 16        # 16-row sublane packing for bf16
    n8 = _round_up(n, sublane)
    tile = min(tile_n, n8)
    if n8 >= 256:
        # Keep >= 2 batch grid steps so the "parallel" axis can shard across
        # the 2 TensorCores of a v7x megacore (near-free on 1-TC chips).
        tile = min(tile, _cdiv(n8, 2))
    tile = _round_up(max(tile, sublane), sublane)

    # ---- hidden-dim (reduction) tiling --------------------------------------
    m = hid_p // 128

    def pick_tile_h(k_cap):
        for k in range(max(1, min(k_cap, m)), 0, -1):   # largest x128 divisor
            if m % k == 0:
                return 128 * k
        return 128

    tile_h = pick_tile_h(max(1, tile_h_cap // 128))

    # ---- VMEM budget: capacity-aware, per-buffer accounting -----------------
    cap = _vmem_capacity_bytes()
    budget = int(cap * 0.75)

    def vmem_need(t, th):
        g_h = hid_p // th
        wbuf = 1 if g_h == 1 else 2          # resident vs. streamed hidden blocks
        need = 2 * t * in_p * bpe_w          # x tile (double-buffered)
        need += wbuf * (in_p * th + th * out_p + th) * bpe_w  # w1/b1/w2 blocks
        need += out_p * bpe_w                # b2 (single-buffered, constant)
        need += 2 * t * out_p * bpe_o        # out tile (double-buffered)
        need += t * out_p * 4                # f32 accumulator scratch
        need += t * th * 4                   # f32 intermediate h
        return need

    while vmem_need(tile, tile_h) > budget and tile_h > 128:
        tile_h = pick_tile_h(tile_h // 128 - 1)
    while vmem_need(tile, tile_h) > budget and tile > sublane:
        tile = _round_up(tile // 2, sublane)
    # TODO(synk): if in_p itself ever blows the VMEM budget, add a second
    # reduction grid axis over the input dim as well.

    n_p = _round_up(n8, tile)
    grid_n = n_p // tile
    grid_h = hid_p // tile_h
    need = vmem_need(tile, tile_h)
    vmem_bytes = int(min(max(need + (4 << 20), 16 << 20), budget))

    # ---- x padding / cast: skipped entirely when already aligned ------------
    if n_p == n and in_p == in_dim and x.dtype == wdt:
        x_p = x
    else:
        x_p = jnp.zeros((n_p, in_p), wdt).at[:n, :in_dim].set(x.astype(wdt))

    # ---- specs ---------------------------------------------------------------
    def _spec(shape, imap, constant):
        if constant:  # constant index map -> single VMEM buffer (stays resident)
            return pl.BlockSpec(shape, imap, pipeline_mode=pl.Buffered(1))
        return pl.BlockSpec(shape, imap)

    weights_resident = (grid_h == 1)
    in_specs = [
        _spec((tile, in_p), lambda i, j: (i, 0), False),              # x tile
        _spec((in_p, tile_h), lambda i, j: (0, j), weights_resident),  # W1 block
        _spec((1, tile_h), lambda i, j: (0, j), weights_resident),     # b1 block
        _spec((tile_h, out_p), lambda i, j: (j, 0), weights_resident), # W2 block
        _spec((1, out_p), lambda i, j: (0, 0), True),                  # b2
    ]
    out_spec = pl.BlockSpec((tile, out_p), lambda i, j: (i, 0))

    w_fetches = 1 if weights_resident else grid_n
    cost = pl.CostEstimate(
        flops=2 * n_p * (in_p * hid_p + hid_p * out_p),
        transcendentals=0,
        bytes_accessed=int(n_p * in_p * bpe_w
                           + w_fetches * (w1_p.size + w2_p.size) * bpe_w
                           + n_p * out_p * bpe_o),
    )

    out_padded = pl.pallas_call(
        mlp_kernel,
        out_shape=jax.ShapeDtypeStruct((n_p, out_p), out_dt),
        grid=(grid_n, grid_h),
        in_specs=in_specs,
        out_specs=out_spec,
        scratch_shapes=[pltpu.VMEM((tile, out_p), jnp.float32)],
        compiler_params=pltpu.CompilerParams(
            dimension_semantics=("parallel", "arbitrary"),
            vmem_limit_bytes=vmem_bytes),
        cost_estimate=cost,
    )(x_p, w1_p, b1_p, w2_p, b2_p)

    return out_padded[:n, :out_dim]


def init_mlp_params(key, input_size, hidden_size, output_size, dtype=jnp.float32):
    """nn.Linear-style init; weights returned already transposed to [in, out]."""
    k1, k2, k3, k4 = jax.random.split(key, 4)
    b1v = 1.0 / (input_size ** 0.5)
    b2v = 1.0 / (hidden_size ** 0.5)
    w1 = jax.random.uniform(k1, (input_size, hidden_size), jnp.float32, -b1v, b1v)
    b1 = jax.random.uniform(k2, (hidden_size,), jnp.float32, -b1v, b1v)
    w2 = jax.random.uniform(k3, (hidden_size, output_size), jnp.float32, -b2v, b2v)
    b2 = jax.random.uniform(k4, (output_size,), jnp.float32, -b2v, b2v)
    return (w1.astype(dtype), b1.astype(dtype), w2.astype(dtype), b2.astype(dtype))


if __name__ == "__main__":
    key = jax.random.PRNGKey(0)
    kx1, kp1, kx2, kp2, kx3, kp3, kx4, kp4 = jax.random.split(key, 8)

    def ref_mlp(x, params):
        w1, b1, w2, b2 = (p.astype(jnp.float32) for p in params)
        return (x.astype(jnp.float32) @ w1 + b1) @ w2 + b2

    # 1) Small demo shapes (matches the module's intended scale).
    x = jax.random.normal(kx1, (8, 32), jnp.float32)
    params = init_mlp_params(kp1, 32, 64, 16)
    padded, dims = prepare_mlp_params(*params)
    out = jax.block_until_ready(mlp_forward(x, padded, dims))
    assert out.shape == (8, 16)
    assert jnp.allclose(out, ref_mlp(x, params), atol=1e-3, rtol=1e-3)

    # 2) Non-aligned batch/features -> exercises padding + batch tiling.
    x2 = jax.random.normal(kx2, (300, 96), jnp.float32)
    params2 = init_mlp_params(kp2, 96, 160, 48)
    padded2, dims2 = prepare_mlp_params(*params2)
    o2 = jax.block_until_ready(mlp_forward(x2, padded2, dims2, tile_n=128))
    assert o2.shape == (300, 48)
    assert jnp.allclose(o2, ref_mlp(x2, params2), atol=1e-3, rtol=1e-3)

    # 3) Hidden dim larger than the hidden tile -> exercises the reduction grid
    #    axis + f32 VMEM accumulator.
    x3 = jax.random.normal(kx3, (64, 256), jnp.float32)
    params3 = init_mlp_params(kp3, 256, 1024, 128)
    padded3, dims3 = prepare_mlp_params(*params3)
    o3 = jax.block_until_ready(mlp_forward(x3, padded3, dims3, tile_h_cap=256))
    assert o3.shape == (64, 128)
    assert jnp.allclose(o3, ref_mlp(x3, params3), atol=1e-2, rtol=1e-2)

    # 4) bf16 parameters (MXU-native path, f32 accumulation preserved).
    x4 = jax.random.normal(kx4, (32, 128), jnp.float32)
    params4 = init_mlp_params(kp4, 128, 256, 64, dtype=jnp.bfloat16)
    padded4, dims4 = prepare_mlp_params(*params4)
    o4 = jax.block_until_ready(mlp_forward(x4, padded4, dims4))
    assert o4.shape == (32, 64)
    assert jnp.allclose(o4.astype(jnp.float32), ref_mlp(x4, params4),
                        atol=1e-1, rtol=1e-1)

    print("KERNEL_OK")
</pallas_src>

<mosaic_0001>
module attributes {stable_mosaic.version = 11 : i64} {
  func.func @mlp_kernel(%arg0: i32, %arg1: i32, %arg2: memref<8x128xf32, #tpu.memory_space<vmem>>, %arg3: memref<128x128xf32, #tpu.memory_space<vmem>>, %arg4: memref<1x128xf32, #tpu.memory_space<vmem>>, %arg5: memref<128x128xf32, #tpu.memory_space<vmem>>, %arg6: memref<1x128xf32, #tpu.memory_space<vmem>>, %arg7: memref<8x128xf32, #tpu.memory_space<vmem>>, %arg8: memref<8x128xf32, #tpu.memory_space<vmem>>) attributes {dimension_semantics = [#tpu.dimension_semantics<parallel>, #tpu.dimension_semantics<arbitrary>], iteration_bounds = array<i64: 1, 1>, scalar_prefetch = 0 : i64, scratch_operands = 1 : i64, tpu.core_type = #tpu.core_type<tc>, window_params = [{transform_indices = @transform_0, window_bounds = array<i64: 8, 128>}, {pipeline_mode = #tpu.pipeline_mode<synchronous>, transform_indices = @transform_1, window_bounds = array<i64: 128, 128>}, {pipeline_mode = #tpu.pipeline_mode<synchronous>, transform_indices = @transform_2, window_bounds = array<i64: 1, 128>}, {pipeline_mode = #tpu.pipeline_mode<synchronous>, transform_indices = @transform_3, window_bounds = array<i64: 128, 128>}, {pipeline_mode = #tpu.pipeline_mode<synchronous>, transform_indices = @transform_4, window_bounds = array<i64: 1, 128>}, {transform_indices = @transform_5, window_bounds = array<i64: 8, 128>}]} {
    %c0_i32 = arith.constant 0 : i32
    %0 = arith.cmpi eq, %arg1, %c0_i32 : i32
    %1 = arith.extui %0 : i1 to i32
    %c0_i32_0 = arith.constant 0 : i32
    %2 = arith.cmpi ne, %1, %c0_i32_0 : i32
    scf.if %2 {
      %cst_15 = arith.constant 0.000000e+00 : f32
      %17 = vector.broadcast %cst_15 : f32 to vector<8x128xf32>
      %c0_16 = arith.constant 0 : index
      %c0_17 = arith.constant 0 : index
      %18 = vector.load %arg8[%c0_16, %c0_17] : memref<8x128xf32, #tpu.memory_space<vmem>>, vector<8x128xf32>
      tpu.vector_store %arg8[%c0_16, %c0_17], %17 {strides = array<i32>} : memref<8x128xf32, #tpu.memory_space<vmem>>, vector<8x128xf32>,
    } else {
    }
    %c0 = arith.constant 0 : index
    %c0_1 = arith.constant 0 : index
    %3 = vector.load %arg2[%c0, %c0_1] : memref<8x128xf32, #tpu.memory_space<vmem>>, vector<8x128xf32>
    %c0_2 = arith.constant 0 : index
    %c0_3 = arith.constant 0 : index
    %4 = vector.load %arg3[%c0_2, %c0_3] : memref<128x128xf32, #tpu.memory_space<vmem>>, vector<128x128xf32>
    %cst = arith.constant dense<0.000000e+00> : vector<8x128xf32>
    %5 = tpu.matmul %3, %4, %cst {dimension_numbers = #tpu.dot_dimension_numbers<[1], [0], [0], [1], [0, 0, 1, 1], [], []>} : vector<8x128xf32>, vector<128x128xf32>, vector<8x128xf32> -> vector<8x128xf32>
    %c0_4 = arith.constant 0 : index
    %c0_5 = arith.constant 0 : index
    %6 = vector.load %arg4[%c0_4, %c0_5] : memref<1x128xf32, #tpu.memory_space<vmem>>, vector<1x128xf32>
    %7 = vector.broadcast %6 : vector<1x128xf32> to vector<8x128xf32>
    %8 = arith.addf %5, %7 : vector<8x128xf32>
    %c0_6 = arith.constant 0 : index
    %c0_7 = arith.constant 0 : index
    %9 = vector.load %arg8[%c0_6, %c0_7] : memref<8x128xf32, #tpu.memory_space<vmem>>, vector<8x128xf32>
    %c0_8 = arith.constant 0 : index
    %c0_9 = arith.constant 0 : index
    %10 = vector.load %arg5[%c0_8, %c0_9] : memref<128x128xf32, #tpu.memory_space<vmem>>, vector<128x128xf32>
    %cst_10 = arith.constant dense<0.000000e+00> : vector<8x128xf32>
    %11 = tpu.matmul %8, %10, %cst_10 {dimension_numbers = #tpu.dot_dimension_numbers<[1], [0], [0], [1], [0, 0, 1, 1], [], []>} : vector<8x128xf32>, vector<128x128xf32>, vector<8x128xf32> -> vector<8x128xf32>
    %12 = arith.addf %9, %11 : vector<8x128xf32>
    %c0_11 = arith.constant 0 : index
    %c0_12 = arith.constant 0 : index
    %13 = vector.load %arg8[%c0_11, %c0_12] : memref<8x128xf32, #tpu.memory_space<vmem>>, vector<8x128xf32>
    tpu.vector_store %arg8[%c0_11, %c0_12], %12 {strides = array<i32>} : memref<8x128xf32, #tpu.memory_space<vmem>>, vector<8x128xf32>,
    %c0_i32_13 = arith.constant 0 : i32
    %14 = arith.cmpi eq, %arg1, %c0_i32_13 : i32
    %15 = arith.extui %14 : i1 to i32
    %c0_i32_14 = arith.constant 0 : i32
    %16 = arith.cmpi ne, %15, %c0_i32_14 : i32
    scf.if %16 {
      %c0_15 = arith.constant 0 : index
      %c0_16 = arith.constant 0 : index
      %17 = vector.load %arg8[%c0_15, %c0_16] : memref<8x128xf32, #tpu.memory_space<vmem>>, vector<8x128xf32>
      %c0_17 = arith.constant 0 : index
      %c0_18 = arith.constant 0 : index
      %18 = vector.load %arg6[%c0_17, %c0_18] : memref<1x128xf32, #tpu.memory_space<vmem>>, vector<1x128xf32>
      %19 = vector.broadcast %18 : vector<1x128xf32> to vector<8x128xf32>
      %20 = arith.addf %17, %19 : vector<8x128xf32>
      %c0_19 = arith.constant 0 : index
      %c0_20 = arith.constant 0 : index
      %21 = vector.load %arg7[%c0_19, %c0_20] : memref<8x128xf32, #tpu.memory_space<vmem>>, vector<8x128xf32>
      tpu.vector_store %arg7[%c0_19, %c0_20], %20 {strides = array<i32>} : memref<8x128xf32, #tpu.memory_space<vmem>>, vector<8x128xf32>,
    } else {
    }
    return
  }
  func.func @transform_0(%arg0: i32, %arg1: i32) -> (i32, i32) {
    %c0_i32 = arith.constant 0 : i32
    %c0_i32_0 = arith.constant 0 : i32
    return %arg0, %c0_i32 : i32, i32
  }
  func.func @transform_1(%arg0: i32, %arg1: i32) -> (i32, i32) {
    %c0_i32 = arith.constant 0 : i32
    %c0_i32_0 = arith.constant 0 : i32
    return %c0_i32, %arg1 : i32, i32
  }
  func.func @transform_2(%arg0: i32, %arg1: i32) -> (i32, i32) {
    %c0_i32 = arith.constant 0 : i32
    %c0_i32_0 = arith.constant 0 : i32
    return %c0_i32, %arg1 : i32, i32
  }
  func.func @transform_3(%arg0: i32, %arg1: i32) -> (i32, i32) {
    %c0_i32 = arith.constant 0 : i32
    %c0_i32_0 = arith.constant 0 : i32
    return %arg1, %c0_i32 : i32, i32
  }
  func.func @transform_4(%arg0: i32, %arg1: i32) -> (i32, i32) {
    %c0_i32 = arith.constant 0 : i32
    %c0_i32_0 = arith.constant 0 : i32
    %c0_i32_1 = arith.constant 0 : i32
    return %c0_i32, %c0_i32_0 : i32, i32
  }
  func.func @transform_5(%arg0: i32, %arg1: i32) -> (i32, i32) {
    %c0_i32 = arith.constant 0 : i32
    %c0_i32_0 = arith.constant 0 : i32
    return %arg0, %c0_i32 : i32, i32
  }
}

</mosaic_0001>

<bundles_post_ra>
// kernel: tpu_custom_call.1
= control target key start
LH: loop header
LB: loop body
LE: loop exit
PB: predicated region body
PF: predicated region fallthrough
CT: control target
= control target key end

     0   :  { %10 = vsyncpa [#allocation4], 0  ;;  %s567_s0 = inlined_call_operand.hbm [shape: f32[8,128], index: 0, kind: input, shape index: {}]   ;;  %s568_s1 = inlined_call_operand.hbm [shape: f32[128,128], index: 1, kind: input, shape index: {}]   ;;  %s569_s2 = inlined_call_operand.vmem [shape: f32[1,128], index: 2, kind: input, shape index: {}]   ;;  %s570_s3 = inlined_call_operand.hbm [shape: f32[128,128], index: 3, kind: input, shape index: {}]   ;;  %s571_s4 = inlined_call_operand.vmem [shape: f32[1,128], index: 4, kind: input, shape index: {}]   ;;  %s572_s5 = inlined_call_operand.hbm [shape: f32[8,128], index: 5, kind: output, shape index: {}]  }
   0x1   :  { %11 = vsyncpa [#allocation7], 0 }
   0x2   :  { %12 = vsyncpa [#allocation5], 0  ;;  %s477_s18 = smov [#allocation6]  }
   0x3   :  { %s28_s19 = sshll.u32 %s477_s18, 4  ;;  %s29_s19 = int_to_ptr.vmem [resolvable:$true] %s28_s19 }
   0x4   :  { %s399_s20 = scalar_lea.vmem %s29_s19, 2048  ;;  %p404_p1 = scmp.lt.s32.totalorder %s29_s19, %s29_s19 }
   0x5   :  { %p400_p0 = scmp.ne.s32.totalorder %s29_s19, %s399_s20  ;;  %p405_p2 = scmp.lt.s32.totalorder %s399_s20, %s399_s20 }
   0x7   :  { %p406_p3 = por %p405_p2, %p404_p1 }
   0x9   :  { %p407_p4 = pnand %p406_p3, %p400_p0 }
   0xb   :  { %410 = shalt.err (!%p407_p4)
}
   0xc   :  { %s478_s21 = smov 128   ;;  %s479_s22 = smov 8  }
   0xd   :  { %34 = dma.hbm_to_vmem [thread:$0]  %s568_s1, 2048, %s29_s19, [#allocation7], %s478_s21, %s478_s21, %s479_s22  }
   0xe   :  { %s480_s25 = smov [#allocation3]   ;;  %s481_s27 = smov [#allocation8]  }
   0xf   :  { %s19_s26 = sshll.u32 %s480_s25, 4  ;;  %s42_s28 = sshll.u32 %s481_s27, 4  ;;  %s20_s26 = int_to_ptr.vmem [resolvable:$true] %s19_s26  ;;  %s43_s28 = int_to_ptr.vmem [resolvable:$true] %s42_s28 }
  0x10   :  { %s419_s29 = scalar_lea.vmem %s20_s26, 128  ;;  %p424_p6 = scmp.lt.s32.totalorder %s20_s26, %s20_s26 }
  0x11   :  { %p420_p5 = scmp.ne.s32.totalorder %s20_s26, %s419_s29  ;;  %p425_p7 = scmp.lt.s32.totalorder %s419_s29, %s419_s29 }
  0x13   :  { %p426_p8 = por %p425_p7, %p424_p6 }
  0x15   :  { %p427_p9 = pnand %p426_p8, %p420_p5 }
  0x17   :  { %430 = shalt.err (!%p427_p9)
}
  0x18   :  { %22 = dma.hbm_to_vmem [thread:$0]  %s567_s0, 128, %s20_s26, [#allocation4]  }
  0x19   :  { %s439_s7 = scalar_lea.vmem %s43_s28, 2048  ;;  %p444_p11 = scmp.lt.s32.totalorder %s43_s28, %s43_s28 }
  0x1a   :  { %p440_p10 = scmp.ne.s32.totalorder %s43_s28, %s439_s7  ;;  %p445_p12 = scmp.lt.s32.totalorder %s439_s7, %s439_s7 }
  0x1c   :  { %p446_p13 = por %p445_p12, %p444_p11 }
  0x1e   :  { %p447_p0 = pnand %p446_p13, %p440_p10 }
  0x20   :  { %450 = shalt.err (!%p447_p0)
}
  0x21   :  { %48 = dma.hbm_to_vmem [thread:$0]  %s570_s3, 2048, %s43_s28, [#allocation7], %s478_s21, %s478_s21, %s479_s22  }
  0x22   :  { %471 = dma.done.wait [#allocation4], 128  }
  0x23   :  { %472 = vsyncadd [#allocation4], 4294967168 }
  0x24   :  { %473 = dma.done.wait [#allocation7], 4096  }
  0x25   :  { %474 = vsyncadd [#allocation7], 4294963200  ;;  %v482_v0 = vmov 0.0   ;;  %vm483_vm0 = vmmov 0   ;;  %v81_v1 = vld [vmem:[#allocation6 + $0x78] sm:$0xff]  ;;  %v80_v2 = vld [vmem:[#allocation6 + $0x70] sm:$0xff] }
  0x26   :  { %313 = vmatprep.subr.mxu0 %v482_v0  ;;  %345 = vmatprep.mubr.msk.f32.mxu0 %vm483_vm0, %v482_v0  ;;  %v79_v3 = vld [vmem:[#allocation6 + $0x68] sm:$0xff]  ;;  %v78_v4 = vld [vmem:[#allocation6 + $0x60] sm:$0xff]  ;;  %v175_v5 = vld [vmem:[#allocation8 + $0x78] sm:$0xff]  ;;  %s484_s11 = smov [#allocation9]  }
  0x27   :  { %348 = vmatprep.subr.mxu1 %v482_v0  ;;  %380 = vmatprep.mubr.msk.f32.mxu1 %vm483_vm0, %v482_v0  ;;  %v77_v6 = vld [vmem:[#allocation6 + $0x58] sm:$0xff]  ;;  %v174_v7 = vld [vmem:[#allocation8 + $0x70] sm:$0xff]  ;;  %v173_v8 = vld [vmem:[#allocation8 + $0x68] sm:$0xff]  ;;  %s267_s12 = sshll.u32 %s484_s11, 4  ;;  %s268_s12 = int_to_ptr.vmem [resolvable:$true] %s267_s12 }
  0x28   :  { %314 = vmatpush3.msra.mxu0 %v81_v1  ;;  %349 = vmatpush3.msra.mxu1 %v175_v5  ;;  %v76_v9 = vld [vmem:[#allocation6 + $0x50] sm:$0xff]  ;;  %v172_v10 = vld [vmem:[#allocation8 + $0x60] sm:$0xff]  ;;  %v75_v11 = vld [vmem:[#allocation6 + $0x48] sm:$0xff]  ;;  %s451_s13 = scalar_lea.vmem %s268_s12, 128  ;;  %p456_p2 = scmp.lt.s32.totalorder %s268_s12, %s268_s12 }
  0x29   :  { %315 = vmatprep.subr.mxu0 %v482_v0  ;;  %350 = vmatprep.subr.mxu1 %v482_v0  ;;  %v171_v12 = vld [vmem:[#allocation8 + $0x58] sm:$0xff]  ;;  %v74_v13 = vld [vmem:[#allocation6 + $0x40] sm:$0xff]  ;;  %v170_v14 = vld [vmem:[#allocation8 + $0x50] sm:$0xff]  ;;  %p452_p1 = scmp.ne.s32.totalorder %s268_s12, %s451_s13  ;;  %p457_p3 = scmp.lt.s32.totalorder %s451_s13, %s451_s13 }
  0x2a   :  { %316 = vmatpush3.msra.mxu0 %v80_v2  ;;  %351 = vmatpush3.msra.mxu1 %v174_v7  ;;  %v73_v15 = vld [vmem:[#allocation6 + $0x38] sm:$0xff]  ;;  %v169_v16 = vld [vmem:[#allocation8 + $0x48] sm:$0xff]  ;;  %v72_v17 = vld [vmem:[#allocation6 + $0x30] sm:$0xff] }
  0x2b   :  { %317 = vmatprep.subr.mxu0 %v482_v0  ;;  %352 = vmatprep.subr.mxu1 %v482_v0  ;;  %v168_v18 = vld [vmem:[#allocation8 + $0x40] sm:$0xff]  ;;  %v71_v19 = vld [vmem:[#allocation6 + $0x28] sm:$0xff]  ;;  %v167_v20 = vld [vmem:[#allocation8 + $0x38] sm:$0xff]  ;;  %p458_p4 = por %p457_p3, %p456_p2 }
  0x2c   :  { %318 = vmatpush3.msra.mxu0 %v79_v3  ;;  %353 = vmatpush3.msra.mxu1 %v173_v8  ;;  %v70_v21 = vld [vmem:[#allocation6 + $0x20] sm:$0xff]  ;;  %v166_v22 = vld [vmem:[#allocation8 + $0x30] sm:$0xff]  ;;  %v69_v23 = vld [vmem:[#allocation6 + $0x18] sm:$0xff] }
  0x2d   :  { %319 = vmatprep.subr.mxu0 %v482_v0  ;;  %354 = vmatprep.subr.mxu1 %v482_v0  ;;  %v165_v24 = vld [vmem:[#allocation8 + $0x28] sm:$0xff]  ;;  %v68_v25 = vld [vmem:[#allocation6 + $0x10] sm:$0xff]  ;;  %v164_v26 = vld [vmem:[#allocation8 + $0x20] sm:$0xff]  ;;  %p459_p5 = pnand %p458_p4, %p452_p1 }
  0x2e   :  { %320 = vmatpush3.msra.mxu0 %v78_v4  ;;  %355 = vmatpush3.msra.mxu1 %v172_v10  ;;  %v67_v27 = vld [vmem:[#allocation6 + $0x8] sm:$0xff]  ;;  %v163_v28 = vld [vmem:[#allocation8 + $0x18] sm:$0xff]  ;;  %v66_v29 = vld [vmem:[#allocation6] sm:$0xff] }
  0x2f   :  { %321 = vmatprep.subr.mxu0 %v482_v0  ;;  %356 = vmatprep.subr.mxu1 %v482_v0  ;;  %v65_v30 = vld [vmem:[#allocation3] sm:$0xff]  ;;  %v162_v31 = vld [vmem:[#allocation8 + $0x10] sm:$0xff]  ;;  %v161_v32 = vld [vmem:[#allocation8 + $0x8] sm:$0xff] }
  0x30   :  { %322 = vmatpush3.msra.mxu0 %v77_v6  ;;  %357 = vmatpush3.msra.mxu1 %v171_v12  ;;  %v160_v33 = vld [vmem:[#allocation8] sm:$0xff]  ;;  %v277_v34 = vld [vmem:[%s569_s2] ss:$0 sm:$0xff] }
  0x31   :  { %323 = vmatprep.subr.mxu0 %v482_v0  ;;  %358 = vmatprep.subr.mxu1 %v482_v0  ;;  %v278_v38 = vld [vmem:[%s571_s4] ss:$0 sm:$0xff] }
  0x32   :  { %324 = vmatpush3.msra.mxu0 %v76_v9  ;;  %359 = vmatpush3.msra.mxu1 %v170_v14 }
  0x33   :  { %325 = vmatprep.subr.mxu0 %v482_v0  ;;  %360 = vmatprep.subr.mxu1 %v482_v0 }
  0x34   :  { %326 = vmatpush3.msra.mxu0 %v75_v11  ;;  %361 = vmatpush3.msra.mxu1 %v169_v16 }
  0x35   :  { %327 = vmatprep.subr.mxu0 %v482_v0  ;;  %362 = vmatprep.subr.mxu1 %v482_v0 }
  0x36   :  { %328 = vmatpush3.msra.mxu0 %v74_v13  ;;  %363 = vmatpush3.msra.mxu1 %v168_v18 }
  0x37   :  { %329 = vmatprep.subr.mxu0 %v482_v0  ;;  %364 = vmatprep.subr.mxu1 %v482_v0 }
  0x38   :  { %330 = vmatpush3.msra.mxu0 %v73_v15  ;;  %365 = vmatpush3.msra.mxu1 %v167_v20 }
  0x39   :  { %331 = vmatprep.subr.mxu0 %v482_v0  ;;  %366 = vmatprep.subr.mxu1 %v482_v0 }
  0x3a   :  { %332 = vmatpush3.msra.mxu0 %v72_v17  ;;  %367 = vmatpush3.msra.mxu1 %v166_v22 }
  0x3b   :  { %333 = vmatprep.subr.mxu0 %v482_v0  ;;  %368 = vmatprep.subr.mxu1 %v482_v0 }
  0x3c   :  { %334 = vmatpush3.msra.mxu0 %v71_v19  ;;  %369 = vmatpush3.msra.mxu1 %v165_v24 }
  0x3d   :  { %335 = vmatprep.subr.mxu0 %v482_v0  ;;  %370 = vmatprep.subr.mxu1 %v482_v0 }
  0x3e   :  { %336 = vmatpush3.msra.mxu0 %v70_v21  ;;  %371 = vmatpush3.msra.mxu1 %v164_v26 }
  0x3f   :  { %337 = vmatprep.subr.mxu0 %v482_v0  ;;  %372 = vmatprep.subr.mxu1 %v482_v0 }
  0x40   :  { %338 = vmatpush3.msra.mxu0 %v69_v23  ;;  %373 = vmatpush3.msra.mxu1 %v163_v28 }
  0x41   :  { %339 = vmatprep.subr.mxu0 %v482_v0  ;;  %374 = vmatprep.subr.mxu1 %v482_v0 }
  0x42   :  { %340 = vmatpush3.msra.mxu0 %v68_v25  ;;  %375 = vmatpush3.msra.mxu1 %v162_v31 }
  0x43   :  { %341 = vmatprep.subr.mxu0 %v482_v0  ;;  %376 = vmatprep.subr.mxu1 %v482_v0 }
  0x44   :  { %342 = vmatpush3.msra.mxu0 %v67_v27  ;;  %377 = vmatpush3.msra.mxu1 %v161_v32 }
  0x45   :  { %343 = vmatprep.subr.mxu0 %v482_v0  ;;  %378 = vmatprep.subr.mxu1 %v482_v0 }
  0x46   :  { %344 = vmatpush3.msra.mxu0 %v66_v29  ;;  %379 = vmatpush3.msra.mxu1 %v160_v33 }
  0x47   :  { %346 = vmatmul.mubr.f32.vlgmr.msra.gmra.mxu0 %v65_v30 }
 0x107   :  { %v155_v35 = vpop.f32.mrf.mxu0 }
 0x108   :  { %v156_v36 = vadd.f32 %v277_v34, %v155_v35 }
 0x109   :  { %v347_v37 = vpop.f32.mrf.mxu0 }
 0x10a   :  { %381 = vmatmul.mubr.f32.vlgmr.msra.gmra.mxu1 %v156_v36 }
 0x1ca   :  { %v242_v39 = vpop.f32.mrf.mxu1 }
 0x1cb   :  { %v259_v40 = vadd.f32 %v278_v38, %v242_v39 }
 0x1cc   :  { %v382_v41 = vpop.f32.mrf.mxu1 }
 0x1cd   :  { %260 = vst [vmem:[#allocation9] sm:$0xff] %v259_v40 }
 0x1ce   :  { %462 = shalt.err (!%p459_p5)
}
 0x1cf   :  { %270 = dma.vmem_to_hbm [thread:$0]  %s268_s12, 128, %s572_s5, [#allocation5]  }
 0x1d0   :  { %475 = dma.done.wait [#allocation5], 128  }
 0x1d1   :  { %476 = vsyncadd [#allocation5], 4294967168 }
 0x1d2   :  { %274 = vsyncpa [#allocation4], 1 }
 0x1d3   :  { %275 = vsyncpa [#allocation7], 1 }
 0x1d4   :  { %276 = vsyncpa [#allocation5], 1 }

</bundles_post_ra>
